<compile_context>
chip_gen: v5e
topology: v5e:2x2
jax: 0.10.0
libtpu: 0.0.40
codegen_flags: <defaults>
</compile_context>

<pallas_src>
import functools

import jax
import jax.numpy as jnp
from jax.experimental import pallas as pl
from jax.experimental.pallas import tpu as pltpu


# ----------------------------- config ("conf") -------------------------------
VOCAB = 50
WORD_DIM = 32      # conf.word_dim
NUM_FILTERS = 32   # conf.num_filters
KERNEL_SIZE = 3    # conf.kernel_size (padding=1 -> same length; K=3 assumed)
SEQ = 16
BATCH = 2


# ------------------------------ Pallas kernel --------------------------------
def body_encoder_kernel(tok_ref, emb_ref, waug_ref, baug_ref, out_ref, *,
                        B, S, F):
    # tok_ref : (B*S, 1) int32   token ids, batch-major
    # emb_ref : (V, D)   f32     full embedding table
    # waug_ref: (K*D, F+1) f32   conv weight (im2col layout) + folded score col
    # baug_ref: (1, F+1)   f32   conv bias + folded score bias
    # out_ref : (B, F)     f32
    BS = B * S
    V, D = emb_ref.shape

    tok = tok_ref[...]                                            # (BS, 1)

    # --- embedding gather as a one-hot matmul on the MXU (exact) ---
    vocab_iota = jax.lax.broadcasted_iota(jnp.int32, (BS, V), 1)
    onehot = (vocab_iota == tok).astype(jnp.float32)              # (BS, V)
    x = jnp.dot(onehot, emb_ref[...],
                preferred_element_type=jnp.float32)               # (BS, D)

    # --- im2col for K=3 "same" conv; zeros at per-sequence boundaries ---
    row = jax.lax.broadcasted_iota(jnp.int32, (BS, 1), 0)
    s_idx = row % S                                               # pos in seq
    x_prev = pltpu.roll(x, shift=1, axis=0)                       # x[i-1]
    x_next = pltpu.roll(x, shift=BS - 1, axis=0)                  # x[i+1]
    x_prev = jnp.where(s_idx == 0, 0.0, x_prev)                   # kill wrap/seq start
    x_next = jnp.where(s_idx == S - 1, 0.0, x_next)               # kill wrap/seq end
    xcol = jnp.concatenate([x_prev, x, x_next], axis=1)           # (BS, K*D)

    # --- fused conv + attention-score linear: one MXU matmul ---
    yaug = jnp.dot(xcol, waug_ref[...],
                   preferred_element_type=jnp.float32) + baug_ref[...]
    y = yaug[:, :F]                                               # (BS, F)
    score = yaug[:, F:F + 1]                                      # (BS, 1)

    mask = (tok > 0).astype(jnp.float32)                          # (BS, 1)
    a = jnp.exp(jnp.tanh(score)) * mask                           # (BS, 1)  (EUP)

    # --- per-sequence reduction: ONE (B, BS) x (BS, F+1) selector matmul ---
    # Columns [0:F] accumulate a*y (numerator), column F accumulates a (denom).
    rb = jax.lax.broadcasted_iota(jnp.int32, (B, BS), 0)
    cj = jax.lax.broadcasted_iota(jnp.int32, (B, BS), 1)
    sel = ((cj >= rb * S) & (cj < rb * S + S)).astype(jnp.float32)
    ay_cat = jnp.concatenate([a * y, a], axis=1)                  # (BS, F+1)
    red = jnp.dot(sel, ay_cat,
                  preferred_element_type=jnp.float32)             # (B, F+1)

    e_unnorm = red[:, :F]                                         # (B, F)
    denom = red[:, F:F + 1] + 1e-6                                # (B, 1)
    out_ref[...] = (e_unnorm * pl.reciprocal(denom)).astype(out_ref.dtype)


def body_encoder_pallas(tokens, embedding, w_conv_pt, b_conv, w_lin, b_lin):
    """tokens: (B, S) int32. Returns e_t: (B, F) float32."""
    B, S = tokens.shape
    F_, D, K = w_conv_pt.shape

    # Parameter re-layout (tiny, parameter-only):
    #   PyTorch (F, D, K) -> im2col (K*D, F); fold Linear(F->1) as extra column.
    w_kdf = jnp.transpose(w_conv_pt, (2, 1, 0)).reshape(K * D, F_)
    w_lin_col = w_lin.reshape(F_, 1)
    w_aug = jnp.concatenate([w_kdf, w_kdf @ w_lin_col], axis=1)          # (K*D, F+1)
    b_aug = jnp.concatenate([b_conv, b_conv @ w_lin_col + b_lin]
                            ).reshape(1, F_ + 1)                         # (1, F+1)
    tok2d = tokens.reshape(B * S, 1).astype(jnp.int32)

    kernel = functools.partial(body_encoder_kernel, B=B, S=S, F=F_)
    out = pl.pallas_call(
        kernel,
        out_shape=jax.ShapeDtypeStruct((B, F_), jnp.float32),
        in_specs=[
            pl.BlockSpec(memory_space=pltpu.MemorySpace.VMEM),   # tokens
            pl.BlockSpec(memory_space=pltpu.MemorySpace.VMEM),   # embedding table
            pl.BlockSpec(memory_space=pltpu.MemorySpace.VMEM),   # fused weight
            pl.BlockSpec(memory_space=pltpu.MemorySpace.VMEM),   # fused bias
        ],
        out_specs=pl.BlockSpec(memory_space=pltpu.MemorySpace.VMEM),
    )(tok2d, embedding.astype(jnp.float32), w_aug, b_aug)
    return out


# ------------------------ pure-JAX reference (checker) -----------------------
def body_encoder_reference(tokens, embedding, w_conv_pt, b_conv, w_lin, b_lin):
    x = embedding[tokens].astype(jnp.float32)                  # (B, S, D)
    xt = jnp.transpose(x, (0, 2, 1))                           # (B, D, S)
    y = jax.lax.conv_general_dilated(
        xt, w_conv_pt, window_strides=(1,), padding=[(1, 1)],
        dimension_numbers=("NCH", "OIH", "NCH"))               # (B, F, S)
    y = y + b_conv[None, :, None]
    y = jnp.transpose(y, (0, 2, 1))                            # (B, S, F)
    mask = (tokens > 0).astype(jnp.float32)
    a = jnp.tanh(jnp.einsum("bsf,f->bs", y, w_lin[0]) + b_lin[0])
    a = jnp.exp(a) * mask
    b = jnp.sum(a, axis=1, keepdims=True) + 1e-6
    alpha = (a / b)[..., None]
    return jnp.sum(alpha * y, axis=1)


# ----------------------------------- main -------------------------------------
if __name__ == "__main__":
    key = jax.random.PRNGKey(0)
    k_emb, k_conv, k_lin, k_tok = jax.random.split(key, 4)

    # Deterministic parameter init (shapes follow the PyTorch module).
    embedding = jax.random.normal(k_emb, (VOCAB, WORD_DIM), jnp.float32) * 0.1

    # Conv1d weight (xavier_uniform), bias zeros.
    fan_in_c = WORD_DIM * KERNEL_SIZE
    fan_out_c = NUM_FILTERS * KERNEL_SIZE
    bound_c = (6.0 / (fan_in_c + fan_out_c)) ** 0.5
    w_conv_pt = jax.random.uniform(
        k_conv, (NUM_FILTERS, WORD_DIM, KERNEL_SIZE),
        jnp.float32, -bound_c, bound_c)
    b_conv = jnp.zeros((NUM_FILTERS,), jnp.float32)

    # Linear(num_filters -> 1) weight (xavier_uniform), bias zeros.
    bound_l = (6.0 / (NUM_FILTERS + 1)) ** 0.5
    w_lin = jax.random.uniform(k_lin, (1, NUM_FILTERS),
                               jnp.float32, -bound_l, bound_l)
    b_lin = jnp.zeros((1,), jnp.float32)

    # Token ids, with some zeros possible so the mask path is exercised.
    tokens = jax.random.randint(k_tok, (BATCH, SEQ), 0, VOCAB, dtype=jnp.int32)

    e_t = body_encoder_pallas(tokens, embedding, w_conv_pt, b_conv, w_lin, b_lin)
    e_t = jax.block_until_ready(e_t)

    ref = body_encoder_reference(tokens, embedding, w_conv_pt, b_conv, w_lin, b_lin)
    assert e_t.shape == (BATCH, NUM_FILTERS)
    assert jnp.allclose(e_t, ref, atol=1e-4, rtol=1e-4), "mismatch vs reference"

    print("KERNEL_OK")
</pallas_src>

<mosaic_0001>
module attributes {stable_mosaic.version = 11 : i64} {
  func.func @body_encoder_kernel(%arg0: memref<32x1xi32, #tpu.memory_space<vmem>>, %arg1: memref<50x32xf32, #tpu.memory_space<vmem>>, %arg2: memref<96x33xf32, #tpu.memory_space<vmem>>, %arg3: memref<1x33xf32, #tpu.memory_space<vmem>>, %arg4: memref<2x32xf32, #tpu.memory_space<vmem>>) attributes {dimension_semantics = [], scalar_prefetch = 0 : i64, scratch_operands = 0 : i64, tpu.core_type = #tpu.core_type<tc>} {
    %c0 = arith.constant 0 : index
    %c0_0 = arith.constant 0 : index
    %0 = vector.load %arg0[%c0, %c0_0] : memref<32x1xi32, #tpu.memory_space<vmem>>, vector<32x1xi32>
    %1 = tpu.iota {dimensions = array<i32: 1>} : vector<32x50xi32>
    %2 = vector.broadcast %0 : vector<32x1xi32> to vector<32x50xi32>
    %3 = arith.cmpi eq, %1, %2 : vector<32x50xi32>
    %4 = arith.extui %3 : vector<32x50xi1> to vector<32x50xi32>
    %5 = arith.sitofp %4 : vector<32x50xi32> to vector<32x50xf32>
    %c0_1 = arith.constant 0 : index
    %c0_2 = arith.constant 0 : index
    %6 = vector.load %arg1[%c0_1, %c0_2] : memref<50x32xf32, #tpu.memory_space<vmem>>, vector<50x32xf32>
    %cst = arith.constant dense<0.000000e+00> : vector<32x32xf32>
    %7 = tpu.matmul %5, %6, %cst {dimension_numbers = #tpu.dot_dimension_numbers<[1], [0], [0], [1], [0, 0, 1, 1], [], []>} : vector<32x50xf32>, vector<50x32xf32>, vector<32x32xf32> -> vector<32x32xf32>
    %8 = tpu.iota {dimensions = array<i32: 0>} : vector<32x1xi32>
    %c16_i32 = arith.constant 16 : i32
    %c0_i32 = arith.constant 0 : i32
    %9 = arith.cmpi eq, %c16_i32, %c0_i32 : i32
    %c1_i32 = arith.constant 1 : i32
    %10 = arith.select %9, %c1_i32, %c16_i32 : i32
    %11 = vector.broadcast %10 : i32 to vector<32x1xi32>
    %12 = arith.remsi %8, %11 : vector<32x1xi32>
    %c0_i32_3 = arith.constant 0 : i32
    %13 = vector.broadcast %c0_i32_3 : i32 to vector<32x1xi32>
    %14 = arith.cmpi ne, %12, %13 : vector<32x1xi32>
    %c0_i32_4 = arith.constant 0 : i32
    %15 = vector.broadcast %c0_i32_4 : i32 to vector<32x1xi32>
    %16 = arith.cmpi slt, %12, %15 : vector<32x1xi32>
    %c0_i32_5 = arith.constant 0 : i32
    %17 = arith.cmpi slt, %10, %c0_i32_5 : i32
    %18 = vector.broadcast %17 : i1 to vector<32x1xi1>
    %19 = vector.broadcast %18 : vector<32x1xi1> to vector<32x1xi1>
    %20 = arith.xori %16, %19 : vector<32x1xi1>
    %21 = arith.andi %20, %14 : vector<32x1xi1>
    %22 = vector.broadcast %10 : i32 to vector<32x1xi32>
    %23 = arith.addi %12, %22 : vector<32x1xi32>
    %24 = arith.select %21, %23, %12 : vector<32x1xi1>, vector<32x1xi32>
    %c1_i32_6 = arith.constant 1 : i32
    %25 = tpu.dynamic_rotate %7 by %c1_i32_6 dim 0 : vector<32x32xf32>, i32 -> vector<32x32xf32>
    %c31_i32 = arith.constant 31 : i32
    %26 = tpu.dynamic_rotate %7 by %c31_i32 dim 0 : vector<32x32xf32>, i32 -> vector<32x32xf32>
    %c0_i32_7 = arith.constant 0 : i32
    %27 = vector.broadcast %c0_i32_7 : i32 to vector<32x1xi32>
    %28 = arith.cmpi eq, %24, %27 : vector<32x1xi32>
    %cst_8 = arith.constant 0.000000e+00 : f32
    %29 = vector.shape_cast %28 : vector<32x1xi1> to vector<32x1xi1>
    %30 = vector.broadcast %29 : vector<32x1xi1> to vector<32x32xi1>
    %31 = vector.broadcast %cst_8 : f32 to vector<32x32xf32>
    %32 = arith.select %30, %31, %25 : vector<32x32xi1>, vector<32x32xf32>
    %c15_i32 = arith.constant 15 : i32
    %33 = vector.broadcast %c15_i32 : i32 to vector<32x1xi32>
    %34 = arith.cmpi eq, %24, %33 : vector<32x1xi32>
    %cst_9 = arith.constant 0.000000e+00 : f32
    %35 = vector.shape_cast %34 : vector<32x1xi1> to vector<32x1xi1>
    %36 = vector.broadcast %35 : vector<32x1xi1> to vector<32x32xi1>
    %37 = vector.broadcast %cst_9 : f32 to vector<32x32xf32>
    %38 = arith.select %36, %37, %26 : vector<32x32xi1>, vector<32x32xf32>
    %39 = tpu.concatenate %32, %7, %38 in 1 : vector<32x32xf32>, vector<32x32xf32>, vector<32x32xf32> -> vector<32x96xf32>
    %c0_10 = arith.constant 0 : index
    %c0_11 = arith.constant 0 : index
    %40 = vector.load %arg2[%c0_10, %c0_11] : memref<96x33xf32, #tpu.memory_space<vmem>>, vector<96x33xf32>
    %cst_12 = arith.constant dense<0.000000e+00> : vector<32x33xf32>
    %41 = tpu.matmul %39, %40, %cst_12 {dimension_numbers = #tpu.dot_dimension_numbers<[1], [0], [0], [1], [0, 0, 1, 1], [], []>} : vector<32x96xf32>, vector<96x33xf32>, vector<32x33xf32> -> vector<32x33xf32>
    %c0_13 = arith.constant 0 : index
    %c0_14 = arith.constant 0 : index
    %42 = vector.load %arg3[%c0_13, %c0_14] : memref<1x33xf32, #tpu.memory_space<vmem>>, vector<1x33xf32>
    %43 = vector.broadcast %42 : vector<1x33xf32> to vector<32x33xf32>
    %44 = arith.addf %41, %43 : vector<32x33xf32>
    %45 = vector.extract_strided_slice %44 {offsets = [0, 0], sizes = [32, 32], strides = [1, 1]} : vector<32x33xf32> to vector<32x32xf32>
    %46 = vector.extract_strided_slice %44 {offsets = [0, 32], sizes = [32, 1], strides = [1, 1]} : vector<32x33xf32> to vector<32x1xf32>
    %c0_i32_15 = arith.constant 0 : i32
    %47 = vector.broadcast %c0_i32_15 : i32 to vector<32x1xi32>
    %48 = arith.cmpi sgt, %0, %47 : vector<32x1xi32>
    %49 = arith.extui %48 : vector<32x1xi1> to vector<32x1xi32>
    %50 = arith.sitofp %49 : vector<32x1xi32> to vector<32x1xf32>
    %51 = math.tanh %46 : vector<32x1xf32>
    %52 = math.exp %51 : vector<32x1xf32>
    %53 = arith.mulf %52, %50 : vector<32x1xf32>
    %54 = tpu.iota {dimensions = array<i32: 0>} : vector<2x32xi32>
    %55 = tpu.iota {dimensions = array<i32: 1>} : vector<2x32xi32>
    %c16_i32_16 = arith.constant 16 : i32
    %56 = vector.broadcast %c16_i32_16 : i32 to vector<2x32xi32>
    %57 = arith.muli %54, %56 : vector<2x32xi32>
    %58 = arith.cmpi sge, %55, %57 : vector<2x32xi32>
    %c16_i32_17 = arith.constant 16 : i32
    %59 = vector.broadcast %c16_i32_17 : i32 to vector<2x32xi32>
    %60 = arith.muli %54, %59 : vector<2x32xi32>
    %c16_i32_18 = arith.constant 16 : i32
    %61 = vector.broadcast %c16_i32_18 : i32 to vector<2x32xi32>
    %62 = arith.addi %60, %61 : vector<2x32xi32>
    %63 = arith.cmpi slt, %55, %62 : vector<2x32xi32>
    %64 = arith.andi %58, %63 : vector<2x32xi1>
    %65 = arith.extui %64 : vector<2x32xi1> to vector<2x32xi32>
    %66 = arith.sitofp %65 : vector<2x32xi32> to vector<2x32xf32>
    %67 = vector.broadcast %53 : vector<32x1xf32> to vector<32x32xf32>
    %68 = arith.mulf %67, %45 : vector<32x32xf32>
    %69 = tpu.concatenate %68, %53 in 1 : vector<32x32xf32>, vector<32x1xf32> -> vector<32x33xf32>
    %cst_19 = arith.constant dense<0.000000e+00> : vector<2x33xf32>
    %70 = tpu.matmul %66, %69, %cst_19 {dimension_numbers = #tpu.dot_dimension_numbers<[1], [0], [0], [1], [0, 0, 1, 1], [], []>} : vector<2x32xf32>, vector<32x33xf32>, vector<2x33xf32> -> vector<2x33xf32>
    %71 = vector.extract_strided_slice %70 {offsets = [0, 0], sizes = [2, 32], strides = [1, 1]} : vector<2x33xf32> to vector<2x32xf32>
    %72 = vector.extract_strided_slice %70 {offsets = [0, 32], sizes = [2, 1], strides = [1, 1]} : vector<2x33xf32> to vector<2x1xf32>
    %cst_20 = arith.constant 9.99999997E-7 : f32
    %73 = vector.broadcast %cst_20 : f32 to vector<2x1xf32>
    %74 = arith.addf %72, %73 : vector<2x1xf32>
    %75 = tpu.reciprocal %74 : vector<2x1xf32> -> vector<2x1xf32>
    %76 = vector.broadcast %75 : vector<2x1xf32> to vector<2x32xf32>
    %77 = arith.mulf %71, %76 : vector<2x32xf32>
    %c0_21 = arith.constant 0 : index
    %c0_22 = arith.constant 0 : index
    %78 = vector.load %arg4[%c0_21, %c0_22] : memref<2x32xf32, #tpu.memory_space<vmem>>, vector<2x32xf32>
    tpu.vector_store %arg4[%c0_21, %c0_22], %77 {strides = array<i32>} : memref<2x32xf32, #tpu.memory_space<vmem>>, vector<2x32xf32>,
    return
  }
}

</mosaic_0001>

<bundles_post_ra>
// kernel: tpu_custom_call.1
= control target key start
LH: loop header
LB: loop body
LE: loop exit
PB: predicated region body
PF: predicated region fallthrough
CT: control target
= control target key end

     0   :  { %vm68_vm0 = vcmask 1041408   ;;  %v549_v2 = vmov 0   ;;  %s766_s0 = inlined_call_operand.vmem [shape: s32[32,1], index: 0, kind: input, shape index: {}]   ;;  %s767_s1 = inlined_call_operand.vmem [shape: f32[50,32], index: 1, kind: input, shape index: {}]   ;;  %s768_s2 = inlined_call_operand.vmem [shape: f32[96,33], index: 2, kind: input, shape index: {}]   ;;  %s769_s3 = inlined_call_operand.vmem [shape: f32[1,33], index: 3, kind: input, shape index: {}]   ;;  %s770_s4 = inlined_call_operand.hbm [shape: f32[2,32], index: 4, kind: output, shape index: {}]  }
   0x1   :  { %v583_v0 = vld [vmem:[%s766_s0 + $0x18] sm:$0xff]  ;;  %v588_v1 = vld [vmem:[%s766_s0] sm:$0xff]  ;;  %490 = vset.pattern.permute.xlu1 %v549_v2  ;;  %489 = vset.pattern.permute.xlu0 %v549_v2  ;;  %v54_v3 = vld [vmem:[%s767_s1 + $0x30] sm:$0x3] }
   0x2   :  { %34 = vperm.xlu1 %490, %v583_v0   ;;  %25 = vperm.xlu0 %489, %v588_v1   ;;  %v53_v4 = vld [vmem:[%s767_s1 + $0x28] sm:$0xff]  ;;  %v52_v5 = vld [vmem:[%s767_s1 + $0x20] sm:$0xff] }
   0x3   :  { %449 = vmatpush.msk.msra.mxu0 %vm68_vm0, %v54_v3  ;;  %464 = vmatpush.msk.msra.mxu2 %vm68_vm0, %v54_v3 }
   0x4   :  { %9 = vsyncpa [#allocation3], 0  ;;  %v51_v6 = vld [vmem:[%s767_s1 + $0x18] sm:$0xff]  ;;  %v607_v7 = vld [vmem:[%s766_s0 + $0x10] sm:$0xff]  ;;  %v22_v12 = vlaneseq  ;;  %vm55_vm1 = vcmask 408576   ;;  %v550_v16 = vmov 0.0  }
   0x5   :  { %82 = vmatpush.msra.mxu0 %v53_v4  ;;  %465 = vmatpush.msra.mxu2 %v53_v4  ;;  %v612_v8 = vld [vmem:[%s766_s0 + $0x8] sm:$0xff]  ;;  %v50_v9 = vld [vmem:[%s767_s1 + $0x10] sm:$0xff]  ;;  %v48_v11 = vld [vmem:[%s767_s1] sm:$0xff]  ;;  %s552_s14 = smov 64   ;;  %vm307_vm10 = vcmp.gt.s32.totalorder %v583_v0, 0  ;;  %vm304_vm11 = vcmp.gt.s32.totalorder %v588_v1, 0 }
   0x6   :  { %v49_v10 = vld [vmem:[%s767_s1 + $0x8] sm:$0xff]  ;;  %v625_v13 = vand.u32 127, %v22_v12  ;;  %v635_v23 = vshrl.u32 %v22_v12, 7  ;;  %s551_s1 = smov 32   ;;  %v257_v34 = vld [vmem:[%s768_s2 + $0x58] sm:$0xff]  ;;  %v256_v35 = vld [vmem:[%s768_s2 + $0x50] sm:$0xff] }
   0x7   :  { %83 = vmatpush.msra.mxu0 %v52_v5  ;;  %466 = vmatpush.msra.mxu2 %v52_v5  ;;  %v255_v38 = vld [vmem:[%s768_s2 + $0x48] sm:$0xff]  ;;  %v254_v40 = vld [vmem:[%s768_s2 + $0x40] sm:$0xff]  ;;  %v253_v42 = vld [vmem:[%s768_s2 + $0x38] sm:$0xff]  ;;  %vm306_vm12 = vcmp.gt.s32.totalorder %v607_v7, 0  ;;  %vm305_vm13 = vcmp.gt.s32.totalorder %v612_v8, 0  ;;  %v461_v60 = vsel %vm307_vm10, 1.0, %v550_v16 }
   0x8   :  { %v105_v24 = vadd.s32 24, %v635_v23  ;;  %vm167_vm6 = vcmp.lt.s32.totalorder %v635_v23, 7  ;;  %471 = vmatpush.msra.mxu3 %v257_v34  ;;  %vm158_vm8 = vcmp.lt.s32.totalorder %v635_v23, 1  ;;  %279 = vmatpush.msra.mxu1 %v257_v34  ;;  %v252_v45 = vld [vmem:[%s768_s2 + $0x30] sm:$0xff]  ;;  %v251_v46 = vld [vmem:[%s768_s2 + $0x28] sm:$0xff]  ;;  %v103_v50 = vadd.s32 8, %v635_v23 }
   0x9   :  { %84 = vmatpush.msra.mxu0 %v51_v6  ;;  %467 = vmatpush.msra.mxu2 %v51_v6  ;;  %v250_v54 = vld [vmem:[%s768_s2 + $0x20] sm:$0xff]  ;;  %v249_v55 = vld [vmem:[%s768_s2 + $0x18] sm:$0xff]  ;;  %v248_v56 = vld [vmem:[%s768_s2 + $0x10] sm:$0xff]  ;;  %v104_v59 = vadd.s32 16, %v635_v23  ;;  %v458_v61 = vsel %vm304_vm11, 1.0, %v550_v16  ;;  %v460_v62 = vsel %vm306_vm12, 1.0, %v550_v16 }
   0xa   :  { %31 = vperm.xlu1 %490, %v607_v7   ;;  %28 = vperm.xlu0 %489, %v612_v8   ;;  %v131_v26 = vand.u32 15, %v105_v24  ;;  %v117_v51 = vand.u32 15, %v103_v50  ;;  %v247_v57 = vld [vmem:[%s768_s2 + $0x8] sm:$0xff]  ;;  %v246_v58 = vld [vmem:[%s768_s2] sm:$0xff]  ;;  %v459_v63 = vsel %vm305_vm13, 1.0, %v550_v16  ;;  %v491_v4 = vpack.i.bf16 %v460_v62, %v461_v60  ;;  %s436_s11 = sshll.u32 %s770_s4, 4  ;;  %s437_s11 = int_to_ptr.hbm [resolvable:$true] %s436_s11 }
   0xb   :  { %85 = vmatpush.msra.mxu0 %v50_v9  ;;  %468 = vmatpush.msra.mxu2 %v50_v9  ;;  %v124_v2 = vand.u32 15, %v104_v59  ;;  %v496_v0 = vpack.i.bf16 %v458_v61, %v459_v63  ;;  %vm236_vm15 = vcmask 261120   ;;  %vm241_vm0 = vcmask 523264  }
   0xc   :  { %vm191_vm7 = vcmp.eq.s32.totalorder %v131_v26, 15  ;;  %472 = vmatpush.msra.mxu3 %v256_v35  ;;  %280 = vmatpush.msra.mxu1 %v256_v35  ;;  %vm189_vm9 = vcmp.eq.s32.totalorder %v117_v51, 15  ;;  %vm427_vm10 = vcmask 254976  }
   0xd   :  { %86 = vmatpush.msra.mxu0 %v49_v10  ;;  %469 = vmatpush.msra.mxu2 %v49_v10  ;;  %vm174_vm14 = vcmp.eq.s32.totalorder %v124_v2, 0  ;;  %v110_v10 = vand.u32 15, %v635_v23 }
   0xe   :  { %473 = vmatpush.msra.mxu3 %v255_v38  ;;  %281 = vmatpush.msra.mxu1 %v255_v38 }
   0xf   :  { %87 = vmatpush.msra.mxu0 %v48_v11  ;;  %470 = vmatpush.msra.mxu2 %v48_v11 }
  0x10   :  { %474 = vmatpush.msra.mxu3 %v254_v40  ;;  %282 = vmatpush.msra.mxu1 %v254_v40 }
  0x12   :  { %475 = vmatpush.msra.mxu3 %v253_v42  ;;  %283 = vmatpush.msra.mxu1 %v253_v42 }
  0x14   :  { %476 = vmatpush.msra.mxu3 %v252_v45  ;;  %284 = vmatpush.msra.mxu1 %v252_v45 }
  0x16   :  { %477 = vmatpush.msra.mxu3 %v251_v46  ;;  %285 = vmatpush.msra.mxu1 %v251_v46 }
  0x18   :  { %478 = vmatpush.msra.mxu3 %v250_v54  ;;  %286 = vmatpush.msra.mxu1 %v250_v54 }
  0x1a   :  { %479 = vmatpush.msra.mxu3 %v249_v55  ;;  %287 = vmatpush.msra.mxu1 %v249_v55 }
  0x1c   :  { %480 = vmatpush.msra.mxu3 %v248_v56  ;;  %288 = vmatpush.msra.mxu1 %v248_v56 }
  0x1e   :  { %481 = vmatpush.msra.mxu3 %v247_v57  ;;  %289 = vmatpush.msra.mxu1 %v247_v57 }
  0x20   :  { %482 = vmatpush.msra.mxu3 %v246_v58  ;;  %290 = vmatpush.msra.mxu1 %v246_v58 }
  0x74   :  { %v35_v14 = vpop.permute.xlu1 %34  ;;  %v26_v15 = vpop.permute.xlu0 %25 }
  0x75   :  { %vm39_vm2 = vcmp.eq.s32.totalorder %v625_v13, %v35_v14  ;;  %vm36_vm3 = vcmp.eq.s32.totalorder %v625_v13, %v26_v15 }
  0x76   :  { %v448_v17 = vsel %vm39_vm2, 1.0, %v550_v16  ;;  %v445_v18 = vsel %vm36_vm3, 1.0, %v550_v16  ;;  %vm172_vm2 = vcmp.eq.s32.totalorder %v110_v10, 0 }
  0x77   :  { %450 = vmatmul.msk.f32.vlgmr.msra.gmra.mxu0 %vm55_vm1, %v445_v18  ;;  %453 = vmatmul.msk.f32.vlgmr.msra.gmra.mxu2 %vm55_vm1, %v448_v17 }
  0x7c   :  { %v29_v19 = vpop.permute.xlu0 %28  ;;  %v32_v21 = vpop.permute.xlu1 %31 }
  0x7d   :  { %vm37_vm4 = vcmp.eq.s32.totalorder %v625_v13, %v29_v19  ;;  %vm38_vm5 = vcmp.eq.s32.totalorder %v625_v13, %v32_v21 }
  0x7e   :  { %v446_v20 = vsel %vm37_vm4, 1.0, %v550_v16  ;;  %v447_v22 = vsel %vm38_vm5, 1.0, %v550_v16 }
  0x7f   :  { %451 = vmatmul.msk.f32.gmra.mxu0 %vm55_vm1, %v446_v20 }
  0x87   :  { %452 = vmatmul.msk.f32.gmra.mxu0 %vm55_vm1, %v447_v22  ;;  %vm262_vm1 = vcmask 785408  }
  0xf4   :  { %v638_v25 = vpop.f32.mrf.mxu0 }
  0xf5   :  { %v163_v28 = vrot.slane %v638_v25, 1  ;;  %v154_v31 = vrot.slane %v638_v25, 7 }
  0xfa   :  { %v640_v27 = vpop.f32.mrf.mxu2 }
  0xfb   :  { %v166_v29 = vrot.slane %v640_v27, 1  ;;  %214 = vrot.lane.b32.xlu0 %v640_v27, %s551_s1  ;;  %v157_v8 = vrot.slane %v640_v27, 7 }
  0xfc   :  { %v92_v30 = vpop.f32.mrf.mxu0 }
  0xfd   :  { %v155_v32 = vrot.slane %v92_v30, 7  ;;  %v171_v33 = vsel %vm167_vm6, %v166_v29, %v163_v28  ;;  %v164_v36 = vrot.slane %v92_v30, 1  ;;  %v162_v14 = vsel %vm158_vm8, %v157_v8, %v154_v31 }
  0xfe   :  { %v203_v37 = vsel %vm191_vm7, 0.0, %v171_v33  ;;  %v184_v19 = vsel %vm172_vm2, 0.0, %v162_v14 }
  0xff   :  { %230 = vrot.lane.b32.xlu1 %v203_v37, %s552_s14  ;;  %v665_v39 = vsel %vm158_vm8, %v154_v31, %v155_v32  ;;  %v170_v41 = vsel %vm167_vm6, %v163_v28, %v164_v36  ;;  %v553_v28 = vmov 32  }
 0x100   :  { %501 = vset.pattern.permute.xlu0 %v553_v28  ;;  %503 = vset.pattern.permute.xlu2 %v553_v28 }
 0x101   :  { %502 = vset.pattern.permute.xlu1 %v553_v28 }
 0x103   :  { %224 = vrot.lane.b32.xlu0 %v170_v41, %s552_s14 }
 0x104   :  { %v676_v43 = vpop.f32.mrf.mxu0 }
 0x105   :  { %v156_v44 = vrot.slane %v676_v43, 7  ;;  %212 = vrot.lane.b32.xlu2 %v676_v43, %s551_s1  ;;  %v165_v48 = vrot.slane %v676_v43, 1 }
 0x107   :  { %210 = vrot.lane.b32.xlu1 %v92_v30, %s551_s1  ;;  %v160_v47 = vsel %vm158_vm8, %v155_v32, %v156_v44  ;;  %v168_v49 = vsel %vm167_vm6, %v165_v48, %v166_v29  ;;  %v169_v52 = vsel %vm167_vm6, %v164_v36, %v165_v48  ;;  %v159_v11 = vsel %vm158_vm8, %v156_v44, %v157_v8  ;;  %v504_v29 = vld [vmem:[%s769_s3] ss:$0 sm:$0xff]  ;;  %s554_s3 = smov [#allocation2]  }
 0x108   :  { %v201_v53 = vsel %vm189_vm9, 0.0, %v169_v52  ;;  %v186_v1 = vsel %vm174_vm14, 0.0, %v160_v47  ;;  %s434_s9 = sshll.u32 %s554_s3, 4  ;;  %s435_s9 = int_to_ptr.vmem [resolvable:$true] %s434_s9 }
 0x10b   :  { %492 = vrot.lane.b32.xlu0 %v491_v4, %s551_s1  ;;  %v348_v4 = vmul.u32 16, %v635_v23 }
 0x10d   :  { %228 = vrot.lane.b32.xlu2 %v168_v49, %s552_s14  ;;  %vm349_vm3 = vcmp.ge.s32.totalorder %v625_v13, %v348_v4 }
 0x10f   :  { %497 = vrot.lane.b32.xlu1 %v496_v0, %s551_s1  ;;  %v350_v0 = vadd.s32 16, %v348_v4 }
 0x111   :  { %vm351_vm4 = vcmp.lt.s32.totalorder %v625_v13, %v350_v0 }
 0x112   :  { %vm352_vm5 = vmand %vm349_vm3, %vm351_vm4 }
 0x115   :  { %208 = vrot.lane.b32.xlu2 %v638_v25, %s551_s1 }
 0x11d   :  { %226 = vrot.lane.b32.xlu2 %v201_v53, %s552_s14 }
 0x15f   :  { %v213_v3 = vpop.permute.xlu2 %212 }
 0x160   :  { %v239_v5 = vsel %vm236_vm15, %v186_v1, %v213_v3 }
 0x167   :  { %v229_v6 = vpop.permute.xlu2 %228 }
 0x168   :  { %v244_v7 = vsel %vm241_vm0, %v239_v5, %v229_v6 }
 0x169   :  { %456 = vmatmul.msk.f32.vlgmr.msra.gmra.mxu3 %vm262_vm1, %v244_v7 }
 0x16d   :  { %v215_v9 = vpop.permute.xlu0 %214 }
 0x16e   :  { %v240_v12 = vsel %vm236_vm15, %v159_v11, %v215_v9  ;;  %v462_v9 = vsel %vm352_vm5, 1.0, %v550_v16 }
 0x16f   :  { %v209_v17 = vpop.permute.xlu2 %208 }
 0x170   :  { %v237_v20 = vsel %vm236_vm15, %v184_v19, %v209_v17 }
 0x171   :  { %v231_v15 = vpop.permute.xlu1 %230 }
 0x172   :  { %v245_v18 = vsel %vm241_vm0, %v240_v12, %v231_v15 }
 0x173   :  { %457 = vmatmul.msk.f32.gmra.mxu3 %vm262_vm1, %v245_v18 }
 0x175   :  { %v225_v21 = vpop.permute.xlu0 %224 }
 0x176   :  { %v242_v22 = vsel %vm241_vm0, %v237_v20, %v225_v21 }
 0x177   :  { %454 = vmatmul.msk.f32.vlgmr.msra.gmra.mxu1 %vm262_vm1, %v242_v22  ;;  %v227_v26 = vpop.permute.xlu2 %226 }
 0x179   :  { %v211_v24 = vpop.permute.xlu1 %210 }
 0x17a   :  { %v238_v25 = vsel %vm236_vm15, %v665_v39, %v211_v24 }
 0x17b   :  { %v243_v27 = vsel %vm241_vm0, %v238_v25, %v227_v26 }
 0x17d   :  { %v493_v38 = vpop.permute.xlu0 %492 }
 0x17e   :  { %v495_v39 = vunpack.i.h.bf16 %v493_v38  ;;  %v494_v49 = vunpack.i.l.bf16 %v493_v38 }
 0x17f   :  { %455 = vmatmul.msk.f32.gmra.mxu1 %vm262_vm1, %v243_v27 }
 0x181   :  { %v498_v53 = vpop.permute.xlu1 %497 }
 0x182   :  { %v499_v54 = vunpack.i.l.bf16 %v498_v53  ;;  %v500_v56 = vunpack.i.h.bf16 %v498_v53 }
 0x1ec   :  { %v298_v30 = vpop.f32.mrf.mxu3 }
 0x1ed   :  { %v299_v31 = vadd.f32 %v504_v29, %v298_v30 }
 0x1ef   :  { %505 = vtanh.f32 %v299_v31 }
 0x1f4   :  { %v292_v32 = vpop.f32.mrf.mxu1 }
 0x1f5   :  { %v506_v33 = vpop.eup %505  ;;  %v293_v35 = vadd.f32 %v504_v29, %v292_v32 }
 0x1f6   :  { %v324_v34 = vmul.f32 1.442695, %v506_v33  ;;  %v301_v36 = vpop.f32.mrf.mxu3 }
 0x1f7   :  { %v302_v37 = vadd.f32 %v504_v29, %v301_v36 }
 0x1f8   :  { %507 = vpow2.f32 %v324_v34 }
 0x1f9   :  { %509 = vtanh.f32 %v302_v37 }
 0x1fa   :  { %511 = vtanh.f32 %v293_v35 }
 0x1fc   :  { %v295_v40 = vpop.f32.mrf.mxu1 }
 0x1fd   :  { %v296_v41 = vadd.f32 %v504_v29, %v295_v40 }
 0x1fe   :  { %v508_v42 = vpop.eup %507 }
 0x1ff   :  { %v510_v43 = vpop.eup %509  ;;  %513 = vtanh.f32 %v296_v41  ;;  %v346_v44 = vmul.f32 %v508_v42, %v495_v39 }
 0x200   :  { %v512_v45 = vpop.eup %511  ;;  %v326_v46 = vmul.f32 1.442695, %v510_v43 }
 0x201   :  { %367 = vperm.xlu0 %501, %v346_v44   ;;  %v320_v47 = vmul.f32 1.442695, %v512_v45 }
 0x202   :  { %515 = vpow2.f32 %v326_v46 }
 0x203   :  { %517 = vpow2.f32 %v320_v47 }
 0x205   :  { %v514_v48 = vpop.eup %513 }
 0x206   :  { %v322_v50 = vmul.f32 1.442695, %v514_v48 }
 0x208   :  { %v516_v51 = vpop.eup %515  ;;  %519 = vpow2.f32 %v322_v50 }
 0x209   :  { %v347_v52 = vmul.f32 %v516_v51, %v494_v49  ;;  %v518_v55 = vpop.eup %517 }
 0x20a   :  { %v344_v59 = vmul.f32 %v518_v55, %v500_v56 }
 0x20b   :  { %372 = vperm.xlu2 %503, %v347_v52  }
 0x20e   :  { %v520_v57 = vpop.eup %519 }
 0x20f   :  { %v345_v58 = vmul.f32 %v520_v57, %v499_v54 }
 0x211   :  { %362 = vperm.xlu1 %502, %v345_v58  }
 0x213   :  { %357 = vperm.xlu2 %503, %v344_v59  }
 0x265   :  { %v373_v60 = vpop.permute.xlu2 %372 }
 0x266   :  { %v378_v61 = vmul.f32 %v373_v60, %v302_v37 }
 0x268   :  { %v382_v62 = vsel %vm236_vm15, %v378_v61, %v347_v52 }
 0x269   :  { %398 = vmatpush.msrb.mxu2 %v382_v62 }
 0x26d   :  { %v358_v1 = vpop.permute.xlu2 %357 }
 0x26e   :  { %v375_v6 = vmul.f32 %v358_v1, %v293_v35 }
 0x270   :  { %v379_v10 = vsel %vm236_vm15, %v375_v6, %v344_v59 }
 0x273   :  { %v368_v63 = vpop.permute.xlu0 %367 }
 0x274   :  { %v377_v2 = vmul.f32 %v368_v63, %v299_v31 }
 0x276   :  { %v381_v3 = vsel %vm236_vm15, %v377_v2, %v346_v44 }
 0x277   :  { %399 = vmatpush.msrb.mxu2 %v381_v3 }
 0x283   :  { %v363_v5 = vpop.permute.xlu1 %362 }
 0x284   :  { %v376_v7 = vmul.f32 %v363_v5, %v296_v41 }
 0x286   :  { %v380_v8 = vsel %vm236_vm15, %v376_v7, %v345_v58 }
 0x287   :  { %400 = vmatpush.msrb.mxu2 %v380_v8 }
 0x289   :  { %401 = vmatpush.msrb.mxu2 %v379_v10 }
 0x28a   :  { %463 = vmatmul.msk.f32.vlgmr.msrb.gmra.mxu2 %vm236_vm15, %v462_v9 }
 0x30d   :  { %v403_v23 = vpop.f32.mrf.mxu2 }
 0x30e   :  { %v406_v11 = vadd.f32 1e-06, %v403_v23 }
 0x310   :  { %521 = vrcp.f32 %v406_v11  ;;  %v418_v15 = vand.u32 2147483648, %v406_v11  ;;  %v416_v18 = vand.u32 2147483647, %v406_v11  ;;  %vm412_vm7 = vweird.f32 %v406_v11 }
 0x312   :  { %v419_v20 = vor.u32 1.1754944e-38, %v418_v15  ;;  %vm417_vm9 = vcmp.eq.f32.partialorder %v416_v18, 8.507059e+37 }
 0x316   :  { %v522_v12 = vpop.eup %521 }
 0x317   :  { %v408_v14 = vmul.f32 %v522_v12, %v406_v11  ;;  %vm413_vm6 = vweird.f32 %v522_v12 }
 0x318   :  { %vm414_vm8 = vmor %vm412_vm7, %vm413_vm6 }
 0x319   :  { %v409_v13 = vsub.f32 1.0, %v408_v14 }
 0x31b   :  { %v410_v17 = vmul.f32 %v522_v12, %v409_v13 }
 0x31d   :  { %v411_v19 = vadd.f32 %v522_v12, %v410_v17 }
 0x31f   :  { %v415_v16 = vsel %vm414_vm8, %v522_v12, %v411_v19 }
 0x320   :  { %v420_v21 = vsel %vm417_vm9, %v419_v20, %v415_v16 }
 0x321   :  { %423 = vperm.xlu1 %502, %v420_v21  }
 0x393   :  { %v424_v22 = vpop.permute.xlu1 %423 }
 0x394   :  { %v426_v24 = vmul.f32 %v424_v22, %v403_v23 }
 0x396   :  { %428 = vst.msk [vmem:[#allocation2] sm:$0x3] %vm427_vm10, %v426_v24 }
 0x397   :  { %439 = dma.vmem_to_hbm [thread:$0]  %s435_s9, 32, %s437_s11, [#allocation3]  }
 0x398   :  { %547 = dma.done.wait [#allocation3], 32  }
 0x399   :  { %548 = vsyncadd [#allocation3], 4294967264 }
 0x39a   :  { %444 = vsyncpa [#allocation3], 1 }

</bundles_post_ra>
